<compile_context>
chip_gen: v7x
topology: tpu7x:2x2x1
jax: 0.10.0
libtpu: 0.0.40
codegen_flags: <defaults>
</compile_context>

<pallas_src>
import functools

import jax
import jax.numpy as jnp
from jax.experimental import pallas as pl
from jax.experimental.pallas import tpu as pltpu


def _round_up(x, m):
    return (x + m - 1) // m * m


def _standardize_weight(w, gain, eps=1e-4):
    # w: (Cin, Cout, kH, kW) (ConvTranspose2d layout), gain: (Cin, 1, 1, 1).
    # Matches torch: var_mean over dims (1,2,3) is unbiased (ddof=1);
    # scale = rsqrt(max(var*fan_in, eps)) * gain; return w*scale - mean*scale.
    fan_in = w.shape[1] * w.shape[2] * w.shape[3]
    mean = jnp.mean(w, axis=(1, 2, 3), keepdims=True)
    var = jnp.var(w, axis=(1, 2, 3), keepdims=True, ddof=1)
    scale = jax.lax.rsqrt(jnp.maximum(var * fan_in, eps)) * gain
    return w * scale - mean * scale


def _tap_weights(w_std, ks):
    # conv_transpose2d == correlation of the zero-dilated, (ks-1-p)-padded input with the
    # spatially flipped, channel-swapped kernel: tap t = di*ks + dj uses
    #   W_eff[co, ci] = w_std[ci, co, ks-1-di, ks-1-dj].
    w_flip = w_std[:, :, ::-1, ::-1]              # (Cin, Cout, ks, ks)
    w_t = jnp.transpose(w_flip, (2, 3, 1, 0))     # (di, dj, Cout, Cin)
    return w_t.reshape(ks * ks, w_std.shape[1], w_std.shape[0])


def gated_ws_transpose_conv(x_nchw, params, *, ks, stride, band_h=8):
    w_s, g_s, b_s = params["w_sig"], params["gain_sig"], params["b_sig"]
    w_g, g_g, b_g = params["w_gate"], params["gain_gate"], params["b_gate"]
    N, Cin, H, W = x_nchw.shape
    Cout = w_s.shape[1]
    p = (ks - 1) // 2
    pad_eff = ks - 1 - p
    Ho = (H - 1) * stride - 2 * p + ks
    Wo = (W - 1) * stride - 2 * p + ks

    # ---- parameter glue (once per call; fuses under jit) -------------------------------
    # Fused (2*Cout, Kp) weight matrix: ks^2*Cin tap columns + one bias column (+ zero pad
    # up to a sublane multiple).  The x1.8 gain is folded into the signal half.
    k_taps = ks * ks * Cin
    k_tot = k_taps + 1
    k_pad = _round_up(k_tot, 8)
    w_taps = jnp.concatenate(
        [_tap_weights(_standardize_weight(w_s, g_s), ks) * 1.8,
         _tap_weights(_standardize_weight(w_g, g_g), ks)],
        axis=1)                                                   # (ks*ks, 2*Cout, Cin)
    w_mat = jnp.transpose(w_taps, (1, 0, 2)).reshape(2 * Cout, k_taps)   # col = t*Cin + ci
    b_col = jnp.concatenate([b_s * 1.8, b_g]).reshape(2 * Cout, 1)
    w_full = jnp.concatenate(
        [w_mat, b_col, jnp.zeros((2 * Cout, k_pad - k_tot), w_mat.dtype)],
        axis=1).astype(jnp.float32)                               # (2*Cout, k_pad)

    # ---- data glue: 128-lane row stride + per-band windows (with (ks-1)-row halo) ------
    if stride > 1:
        Hd, Wd = (H - 1) * stride + 1, (W - 1) * stride + 1
        x_dil = jnp.zeros((N, Cin, Hd, Wd), x_nchw.dtype)
        x_dil = x_dil.at[:, :, ::stride, ::stride].set(x_nchw)
    else:
        Hd, Wd = H, W
        x_dil = x_nchw
    Hp, Wp = Hd + 2 * pad_eff, Wd + 2 * pad_eff
    assert Ho == Hp - ks + 1 and Wo == Wp - ks + 1

    band_h = max(1, min(band_h, Ho))
    n_bands = -(-Ho // band_h)
    Ho_pad = n_bands * band_h
    Wq = _round_up(Wp, 128)             # lane-aligned row stride
    M = band_h * Wq                     # dot lane width (multiple of 256 for band_h >= 2)
    hrows = Ho_pad + ks - 1             # rows needed to cover every band incl. halo
    wwin0 = (band_h + ks - 1) * Wq
    wwin = _round_up(wwin0 + ks - 1, 128)

    # Zero-padded image with 128-lane row stride, then per-band (halo) windows flattened to
    # one lane axis so every in-kernel tap offset is the static di*Wq + dj.
    xp = jnp.zeros((N, Cin, hrows, Wq), x_nchw.dtype)
    xp = xp.at[:, :, pad_eff:pad_eff + Hd, pad_eff:pad_eff + Wd].set(x_dil)
    row_idx = (jnp.arange(n_bands)[:, None] * band_h
               + jnp.arange(band_h + ks - 1)[None, :])            # (n_bands, band_h+ks-1)
    x_win = xp[:, :, row_idx, :]                                  # (N, Cin, n_bands, bh+ks-1, Wq)
    x_win = jnp.transpose(x_win, (0, 2, 1, 3, 4)).reshape(N, n_bands, Cin, wwin0)
    x_win = jnp.pad(x_win, ((0, 0), (0, 0), (0, 0), (0, wwin - wwin0)))

    def kernel(x_ref, w_ref, o_ref, slab_ref):
        # x_ref: (1, 1, Cin, wwin)   w_ref: (2*Cout, k_pad)
        # o_ref: (1, Cout, M)        slab_ref: (k_pad, M) f32 VMEM scratch (im2col slab)
        # Constant rows: bias rides the matmul as an all-ones K row; the sublane-padding
        # rows are zeroed so padded weight columns never multiply garbage.  Written every
        # step (trivially cheap) so each megacore TC is self-contained for any grid slice.
        slab_ref[pl.ds(k_taps, 1), :] = jnp.ones((1, M), jnp.float32)
        if k_pad - k_tot > 0:
            slab_ref[pl.ds(k_tot, k_pad - k_tot), :] = jnp.zeros((k_pad - k_tot, M),
                                                                 jnp.float32)
        # Gather the ks^2 shifted tap slices.  Row stride Wq is a multiple of 128, so the
        # di part of each offset is lane-aligned; only the small static dj shift crosses
        # lanes (and overlaps the MXU work of the previous step).
        for di in range(ks):
            for dj in range(ks):
                t = di * ks + dj
                off = di * Wq + dj
                slab_ref[pl.ds(t * Cin, Cin), :] = (
                    x_ref[0, 0, :, pl.ds(off, M)].astype(jnp.float32))
        # One deep matmul: (2*Cout, k_pad) x (k_pad, M) -> f32; bias already inside.
        acc = jnp.dot(w_ref[...], slab_ref[...], preferred_element_type=jnp.float32)
        sig = acc[:Cout]
        gate = acc[Cout:]
        o_ref[0] = (sig * jax.nn.sigmoid(gate)).astype(o_ref.dtype)

    out = pl.pallas_call(
        kernel,
        out_shape=jax.ShapeDtypeStruct((N, Cout, Ho_pad * Wq), x_nchw.dtype),
        grid_spec=pltpu.PrefetchScalarGridSpec(
            num_scalar_prefetch=0,
            grid=(N, n_bands),
            in_specs=[
                pl.BlockSpec((1, 1, Cin, wwin), lambda n, b: (n, b, 0, 0)),
                pl.BlockSpec((2 * Cout, k_pad), lambda n, b: (0, 0)),
            ],
            out_specs=pl.BlockSpec((1, Cout, M), lambda n, b: (n, 0, b)),
            scratch_shapes=[pltpu.VMEM((k_pad, M), jnp.float32)],
        ),
        compiler_params=pltpu.CompilerParams(
            dimension_semantics=("parallel", "parallel"),
            vmem_limit_bytes=32 * 1024 * 1024,
        ),
    )(x_win, w_full)

    # Already NCHW-ordered and lane-dense: drop the band/row/lane padding.
    return out.reshape(N, Cout, Ho_pad, Wq)[:, :, :Ho, :Wo]


def reference_forward(x_nchw, params, *, ks, stride):
    """Pure-JAX reference using XLA's dilated conv (independent code path)."""
    p = (ks - 1) // 2

    def tconv(w, gain, b):
        w_std = _standardize_weight(w, gain)
        w_ref = jnp.transpose(w_std, (1, 0, 2, 3))[:, :, ::-1, ::-1]  # (Cout, Cin, kh, kw)
        y = jax.lax.conv_general_dilated(
            x_nchw, w_ref, window_strides=(1, 1),
            padding=[(ks - 1 - p, ks - 1 - p)] * 2,
            lhs_dilation=(stride, stride),
            dimension_numbers=("NCHW", "OIHW", "NCHW"))
        return y + b.reshape(1, -1, 1, 1)

    sig = tconv(params["w_sig"], params["gain_sig"], params["b_sig"])
    gat = tconv(params["w_gate"], params["gain_gate"], params["b_gate"])
    return sig * jax.nn.sigmoid(gat) * 1.8


if __name__ == "__main__":
    # Small shapes consistent with the module: GatedWSTransposeConvPadded(4, 8, ks=3, stride=1)
    N, Cin, Cout, H, W = 2, 4, 8, 16, 16
    ks, stride = 3, 1

    key = jax.random.PRNGKey(0)
    k1, k2, k3, k4, k5 = jax.random.split(key, 5)
    params = {
        # ConvTranspose2d weight layout: (in_ch, out_ch, kH, kW)
        "w_sig": jax.random.normal(k1, (Cin, Cout, ks, ks), jnp.float32) * 0.1,
        "gain_sig": jnp.ones((Cin, 1, 1, 1), jnp.float32),
        "b_sig": jax.random.normal(k2, (Cout,), jnp.float32) * 0.01,
        "w_gate": jax.random.normal(k3, (Cin, Cout, ks, ks), jnp.float32) * 0.1,
        "gain_gate": jnp.ones((Cin, 1, 1, 1), jnp.float32),
        "b_gate": jax.random.normal(k4, (Cout,), jnp.float32) * 0.01,
    }
    x = jax.random.normal(k5, (N, Cin, H, W), jnp.float32)

    fwd = jax.jit(functools.partial(gated_ws_transpose_conv, ks=ks, stride=stride))
    out = jax.block_until_ready(fwd(x, params))

    ref = jax.block_until_ready(reference_forward(x, params, ks=ks, stride=stride))
    assert out.shape == ref.shape, (out.shape, ref.shape)
    err = float(jnp.max(jnp.abs(out - ref)))
    assert err < 1e-4, err

    print("KERNEL_OK")
</pallas_src>

<mosaic_0001>
module attributes {stable_mosaic.version = 11 : i64} {
  func.func @kernel(%arg0: i32, %arg1: i32, %arg2: memref<1x1x4x1408xf32, #tpu.memory_space<vmem>>, %arg3: memref<16x40xf32, #tpu.memory_space<vmem>>, %arg4: memref<1x8x1024xf32, #tpu.memory_space<vmem>>, %arg5: memref<40x1024xf32, #tpu.memory_space<vmem>>) attributes {dimension_semantics = [#tpu.dimension_semantics<parallel>, #tpu.dimension_semantics<parallel>], iteration_bounds = array<i64: 2, 2>, scalar_prefetch = 0 : i64, scratch_operands = 1 : i64, tpu.core_type = #tpu.core_type<tc>, window_params = [{transform_indices = @transform_0, window_bounds = array<i64: 1, 1, 4, 1408>}, {pipeline_mode = #tpu.pipeline_mode<synchronous>, transform_indices = @transform_1, window_bounds = array<i64: 16, 40>}, {transform_indices = @transform_2, window_bounds = array<i64: 1, 8, 1024>}]} {
    %cst = arith.constant 1.000000e+00 : f32
    %0 = vector.broadcast %cst : f32 to vector<1x1024xf32>
    %c36 = arith.constant 36 : index
    %c0 = arith.constant 0 : index
    %1 = vector.load %arg5[%c36, %c0] : memref<40x1024xf32, #tpu.memory_space<vmem>>, vector<1x1024xf32>
    tpu.vector_store %arg5[%c36, %c0], %0 {strides = array<i32>} : memref<40x1024xf32, #tpu.memory_space<vmem>>, vector<1x1024xf32>,
    %cst_0 = arith.constant 0.000000e+00 : f32
    %2 = vector.broadcast %cst_0 : f32 to vector<3x1024xf32>
    %c37 = arith.constant 37 : index
    %c0_1 = arith.constant 0 : index
    %3 = vector.load %arg5[%c37, %c0_1] : memref<40x1024xf32, #tpu.memory_space<vmem>>, vector<3x1024xf32>
    tpu.vector_store %arg5[%c37, %c0_1], %2 {strides = array<i32>} : memref<40x1024xf32, #tpu.memory_space<vmem>>, vector<3x1024xf32>,
    %c0_2 = arith.constant 0 : index
    %c0_3 = arith.constant 0 : index
    %c0_4 = arith.constant 0 : index
    %c0_5 = arith.constant 0 : index
    %4 = vector.load %arg2[%c0_2, %c0_3, %c0_4, %c0_5] : memref<1x1x4x1408xf32, #tpu.memory_space<vmem>>, vector<1x1x4x1024xf32>
    %5 = vector.shape_cast %4 : vector<1x1x4x1024xf32> to vector<4x1024xf32>
    %c0_6 = arith.constant 0 : index
    %c0_7 = arith.constant 0 : index
    %6 = vector.load %arg5[%c0_6, %c0_7] : memref<40x1024xf32, #tpu.memory_space<vmem>>, vector<4x1024xf32>
    tpu.vector_store %arg5[%c0_6, %c0_7], %5 {strides = array<i32>} : memref<40x1024xf32, #tpu.memory_space<vmem>>, vector<4x1024xf32>,
    %c0_8 = arith.constant 0 : index
    %c0_9 = arith.constant 0 : index
    %c0_10 = arith.constant 0 : index
    %c1 = arith.constant 1 : index
    %7 = vector.load %arg2[%c0_8, %c0_9, %c0_10, %c1] : memref<1x1x4x1408xf32, #tpu.memory_space<vmem>>, vector<1x1x4x1024xf32>
    %8 = vector.shape_cast %7 : vector<1x1x4x1024xf32> to vector<4x1024xf32>
    %c4 = arith.constant 4 : index
    %c0_11 = arith.constant 0 : index
    %9 = vector.load %arg5[%c4, %c0_11] : memref<40x1024xf32, #tpu.memory_space<vmem>>, vector<4x1024xf32>
    tpu.vector_store %arg5[%c4, %c0_11], %8 {strides = array<i32>} : memref<40x1024xf32, #tpu.memory_space<vmem>>, vector<4x1024xf32>,
    %c0_12 = arith.constant 0 : index
    %c0_13 = arith.constant 0 : index
    %c0_14 = arith.constant 0 : index
    %c2 = arith.constant 2 : index
    %10 = vector.load %arg2[%c0_12, %c0_13, %c0_14, %c2] : memref<1x1x4x1408xf32, #tpu.memory_space<vmem>>, vector<1x1x4x1024xf32>
    %11 = vector.shape_cast %10 : vector<1x1x4x1024xf32> to vector<4x1024xf32>
    %c8 = arith.constant 8 : index
    %c0_15 = arith.constant 0 : index
    %12 = vector.load %arg5[%c8, %c0_15] : memref<40x1024xf32, #tpu.memory_space<vmem>>, vector<4x1024xf32>
    tpu.vector_store %arg5[%c8, %c0_15], %11 {strides = array<i32>} : memref<40x1024xf32, #tpu.memory_space<vmem>>, vector<4x1024xf32>,
    %c0_16 = arith.constant 0 : index
    %c0_17 = arith.constant 0 : index
    %c0_18 = arith.constant 0 : index
    %c128 = arith.constant 128 : index
    %13 = vector.load %arg2[%c0_16, %c0_17, %c0_18, %c128] : memref<1x1x4x1408xf32, #tpu.memory_space<vmem>>, vector<1x1x4x1024xf32>
    %14 = vector.shape_cast %13 : vector<1x1x4x1024xf32> to vector<4x1024xf32>
    %c12 = arith.constant 12 : index
    %c0_19 = arith.constant 0 : index
    %15 = vector.load %arg5[%c12, %c0_19] : memref<40x1024xf32, #tpu.memory_space<vmem>>, vector<4x1024xf32>
    tpu.vector_store %arg5[%c12, %c0_19], %14 {strides = array<i32>} : memref<40x1024xf32, #tpu.memory_space<vmem>>, vector<4x1024xf32>,
    %c0_20 = arith.constant 0 : index
    %c0_21 = arith.constant 0 : index
    %c0_22 = arith.constant 0 : index
    %c129 = arith.constant 129 : index
    %16 = vector.load %arg2[%c0_20, %c0_21, %c0_22, %c129] : memref<1x1x4x1408xf32, #tpu.memory_space<vmem>>, vector<1x1x4x1024xf32>
    %17 = vector.shape_cast %16 : vector<1x1x4x1024xf32> to vector<4x1024xf32>
    %c16 = arith.constant 16 : index
    %c0_23 = arith.constant 0 : index
    %18 = vector.load %arg5[%c16, %c0_23] : memref<40x1024xf32, #tpu.memory_space<vmem>>, vector<4x1024xf32>
    tpu.vector_store %arg5[%c16, %c0_23], %17 {strides = array<i32>} : memref<40x1024xf32, #tpu.memory_space<vmem>>, vector<4x1024xf32>,
    %c0_24 = arith.constant 0 : index
    %c0_25 = arith.constant 0 : index
    %c0_26 = arith.constant 0 : index
    %c130 = arith.constant 130 : index
    %19 = vector.load %arg2[%c0_24, %c0_25, %c0_26, %c130] : memref<1x1x4x1408xf32, #tpu.memory_space<vmem>>, vector<1x1x4x1024xf32>
    %20 = vector.shape_cast %19 : vector<1x1x4x1024xf32> to vector<4x1024xf32>
    %c20 = arith.constant 20 : index
    %c0_27 = arith.constant 0 : index
    %21 = vector.load %arg5[%c20, %c0_27] : memref<40x1024xf32, #tpu.memory_space<vmem>>, vector<4x1024xf32>
    tpu.vector_store %arg5[%c20, %c0_27], %20 {strides = array<i32>} : memref<40x1024xf32, #tpu.memory_space<vmem>>, vector<4x1024xf32>,
    %c0_28 = arith.constant 0 : index
    %c0_29 = arith.constant 0 : index
    %c0_30 = arith.constant 0 : index
    %c256 = arith.constant 256 : index
    %22 = vector.load %arg2[%c0_28, %c0_29, %c0_30, %c256] : memref<1x1x4x1408xf32, #tpu.memory_space<vmem>>, vector<1x1x4x1024xf32>
    %23 = vector.shape_cast %22 : vector<1x1x4x1024xf32> to vector<4x1024xf32>
    %c24 = arith.constant 24 : index
    %c0_31 = arith.constant 0 : index
    %24 = vector.load %arg5[%c24, %c0_31] : memref<40x1024xf32, #tpu.memory_space<vmem>>, vector<4x1024xf32>
    tpu.vector_store %arg5[%c24, %c0_31], %23 {strides = array<i32>} : memref<40x1024xf32, #tpu.memory_space<vmem>>, vector<4x1024xf32>,
    %c0_32 = arith.constant 0 : index
    %c0_33 = arith.constant 0 : index
    %c0_34 = arith.constant 0 : index
    %c257 = arith.constant 257 : index
    %25 = vector.load %arg2[%c0_32, %c0_33, %c0_34, %c257] : memref<1x1x4x1408xf32, #tpu.memory_space<vmem>>, vector<1x1x4x1024xf32>
    %26 = vector.shape_cast %25 : vector<1x1x4x1024xf32> to vector<4x1024xf32>
    %c28 = arith.constant 28 : index
    %c0_35 = arith.constant 0 : index
    %27 = vector.load %arg5[%c28, %c0_35] : memref<40x1024xf32, #tpu.memory_space<vmem>>, vector<4x1024xf32>
    tpu.vector_store %arg5[%c28, %c0_35], %26 {strides = array<i32>} : memref<40x1024xf32, #tpu.memory_space<vmem>>, vector<4x1024xf32>,
    %c0_36 = arith.constant 0 : index
    %c0_37 = arith.constant 0 : index
    %c0_38 = arith.constant 0 : index
    %c258 = arith.constant 258 : index
    %28 = vector.load %arg2[%c0_36, %c0_37, %c0_38, %c258] : memref<1x1x4x1408xf32, #tpu.memory_space<vmem>>, vector<1x1x4x1024xf32>
    %29 = vector.shape_cast %28 : vector<1x1x4x1024xf32> to vector<4x1024xf32>
    %c32 = arith.constant 32 : index
    %c0_39 = arith.constant 0 : index
    %30 = vector.load %arg5[%c32, %c0_39] : memref<40x1024xf32, #tpu.memory_space<vmem>>, vector<4x1024xf32>
    tpu.vector_store %arg5[%c32, %c0_39], %29 {strides = array<i32>} : memref<40x1024xf32, #tpu.memory_space<vmem>>, vector<4x1024xf32>,
    %c0_40 = arith.constant 0 : index
    %c0_41 = arith.constant 0 : index
    %31 = vector.load %arg3[%c0_40, %c0_41] : memref<16x40xf32, #tpu.memory_space<vmem>>, vector<16x40xf32>
    %c0_42 = arith.constant 0 : index
    %c0_43 = arith.constant 0 : index
    %32 = vector.load %arg5[%c0_42, %c0_43] : memref<40x1024xf32, #tpu.memory_space<vmem>>, vector<40x1024xf32>
    %cst_44 = arith.constant dense<0.000000e+00> : vector<16x1024xf32>
    %33 = tpu.matmul %31, %32, %cst_44 {dimension_numbers = #tpu.dot_dimension_numbers<[1], [0], [0], [1], [0, 0, 1, 1], [], []>} : vector<16x40xf32>, vector<40x1024xf32>, vector<16x1024xf32> -> vector<16x1024xf32>
    %34 = vector.extract_strided_slice %33 {offsets = [0, 0], sizes = [8, 1024], strides = [1, 1]} : vector<16x1024xf32> to vector<8x1024xf32>
    %35 = vector.extract_strided_slice %33 {offsets = [8, 0], sizes = [8, 1024], strides = [1, 1]} : vector<16x1024xf32> to vector<8x1024xf32>
    %36 = arith.negf %35 : vector<8x1024xf32>
    %37 = math.exp %36 : vector<8x1024xf32>
    %cst_45 = arith.constant 1.000000e+00 : f32
    %38 = vector.broadcast %cst_45 : f32 to vector<8x1024xf32>
    %39 = arith.addf %38, %37 : vector<8x1024xf32>
    %40 = arith.divf %38, %39 : vector<8x1024xf32>
    %41 = arith.mulf %34, %40 : vector<8x1024xf32>
    %c0_46 = arith.constant 0 : index
    %c0_47 = arith.constant 0 : index
    %c0_48 = arith.constant 0 : index
    %42 = vector.load %arg4[%c0_46, %c0_47, %c0_48] : memref<1x8x1024xf32, #tpu.memory_space<vmem>>, vector<1x8x1024xf32>
    %43 = vector.shape_cast %42 : vector<1x8x1024xf32> to vector<8x1024xf32>
    %44 = vector.shape_cast %41 : vector<8x1024xf32> to vector<1x8x1024xf32>
    tpu.vector_store %arg4[%c0_46, %c0_47, %c0_48], %44 {strides = array<i32>} : memref<1x8x1024xf32, #tpu.memory_space<vmem>>, vector<1x8x1024xf32>,
    return
  }
  func.func @transform_0(%arg0: i32, %arg1: i32) -> (i32, i32, i32, i32) {
    %c0_i32 = arith.constant 0 : i32
    %c0_i32_0 = arith.constant 0 : i32
    %c0_i32_1 = arith.constant 0 : i32
    return %arg0, %arg1, %c0_i32, %c0_i32_0 : i32, i32, i32, i32
  }
  func.func @transform_1(%arg0: i32, %arg1: i32) -> (i32, i32) {
    %c0_i32 = arith.constant 0 : i32
    %c0_i32_0 = arith.constant 0 : i32
    %c0_i32_1 = arith.constant 0 : i32
    return %c0_i32, %c0_i32_0 : i32, i32
  }
  func.func @transform_2(%arg0: i32, %arg1: i32) -> (i32, i32, i32) {
    %c0_i32 = arith.constant 0 : i32
    %c0_i32_0 = arith.constant 0 : i32
    return %arg0, %c0_i32, %arg1 : i32, i32, i32
  }
}

</mosaic_0001>

<bundles_post_ra>
// kernel: gated_ws_transpose_conv.1
= control target key start
LH: loop header
LB: loop body
LE: loop exit
PB: predicated region body
PF: predicated region fallthrough
CT: control target
= control target key end

     0   :  { %s1336_s9 = smov 0   ;;  %s1338_s10 = smov 0   ;;  %s1693_s0 = inlined_call_operand.vmem [shape: f32[2,2,4,1408], index: 0, kind: input, shape index: {}]   ;;  %s1694_s1 = inlined_call_operand.vmem [shape: f32[16,40], index: 1, kind: input, shape index: {}]   ;;  %s1695_s2 = inlined_call_operand.vmem [shape: f32[2,8,2048], index: 2, kind: output, shape index: {}]  }
   0x1   :  { %s1340_s11 = smov 0   ;;  %s1342_s12 = smov 0  }
   0x2   :  { %s1344_s13 = smov 0  }
   0x3 LB: > { %s21_s14 = sadd.s32 1, %s1307_s11  ;;  %s24_s15 = sadd.s32 1, %s1311_s12  ;;  %s1315_s13 = sphi %s1344_s13, %s12_s13   ;;  %s1311_s12 = sphi %s1342_s12, %s1699_s12   ;;  %s1307_s11 = sphi %s1340_s11, %s1698_s11   ;;  %s1303_s10 = sphi %s1338_s10, %s1697_s10   ;;  %s1299_s9 = sphi %s1336_s9, %s1696_s9  }
   0x4   : > { %p22_p0 = scmp.ge.s32.totalorder %s21_s14, 2  ;;  %p1123_p1 = scmp.ge.s32.totalorder %s1315_s13, 1 }
   0x5   : > { %p132_p2 = scmp.lt.s32.totalorder %s1315_s13, 5 }
   0x6   : > { %s1701_s14 = smov (%p22_p0, %s21_s14), 0  ;;  %s1703_s15 = smov (!%p22_p0, %s24_s15), %s1311_s12 }
   0x7   : > { %p133_p3 = pnand %p1123_p1, %p132_p2  ;;  %p26_p4 = scmp.ge.s32.totalorder %s1703_s15, 2 }
   0x8   : > { %p162_p5 = scmp.lt.s32.totalorder (!%p133_p3), %s1303_s10, 1  ;;  %p164_p6 = scmp.lt.s32.totalorder (!%p133_p3), %s1299_s9, 1  ;;  %v1319_v25 = vmov (!%p133_p3), 1.0   ;;  %v1320_v26 = vmov (!%p133_p3), 0.0   ;;  %vm249_vm0 = vcmask (!%p133_p3), 1039360   ;;  %vm306_vm1 = vcmask (!%p133_p3), 1031168  }
   0x9   : > { %s1705_s15 = smov (%p26_p4, %s1703_s15), 0  ;;  %136 = sbr.rel (%p133_p3) target bundleno = 501 (0x1f5), region = 28 }
   0xa   : > { %s1317_s24 = smov (!%p133_p3), 127   ;;  %s1318_s25 = smov (!%p133_p3), 126   ;;  %182 = vst [vmem:[#allocation2 + $0x104] ss:$8 sm:$0xf] (!%p133_p3), %v1319_v25  ;;  %718 = vmatprep.mubr.f32.mxu0 (!%p133_p3), %v1320_v26  ;;  %795 = vmatprep.mubr.f32.mxu1 (!%p133_p3), %v1320_v26  ;;  %vm647_vm2 = vcmask (!%p133_p3), 326656  }
   0xb   : > { %185 = vst [vmem:[#allocation2 + $0x108] sm:$0xe0] (!%p133_p3), %v1320_v26  ;;  %183 = vst [vmem:[#allocation2 + $0x104] ss:$8 sm:$0xf0] (!%p133_p3), %v1319_v25  ;;  %s1125_s30 = sshll.u32 (!%p133_p3), %s1299_s9, 3 }
   0xc   : > { %184 = vst [vmem:[#allocation2 + $0x100] sm:$0xe0] (!%p133_p3), %v1320_v26  ;;  %186 = vst [vmem:[#allocation2 + $0x110] sm:$0xe0] (!%p133_p3), %v1320_v26  ;;  %p174_p7 = scmp.lt.s32.totalorder (!%p133_p3), %s1125_s30, 15 }
   0xd   : > { %187 = vst [vmem:[#allocation2 + $0x118] sm:$0xe0] (!%p133_p3), %v1320_v26  ;;  %188 = vst [vmem:[#allocation2 + $0x120] sm:$0xe0] (!%p133_p3), %v1320_v26 }
   0xe   : > { %189 = vst [vmem:[#allocation2 + $0x128] sm:$0xe0] (!%p133_p3), %v1320_v26  ;;  %190 = vst [vmem:[#allocation2 + $0x130] sm:$0xe0] (!%p133_p3), %v1320_v26 }
   0xf   : > { %191 = vst [vmem:[#allocation2 + $0x138] sm:$0xe0] (!%p133_p3), %v1320_v26 }
  0x10   : > { %s1707_s10 = smov (!%p162_p5, %s1303_s10), 1  ;;  %s1709_s30 = smov (!%p174_p7, %s1125_s30), 15 }
  0x11   : > { %s165_s16 = scalar_select %p164_p6, %s1299_s9, 1 }
  0x12   : > { %s1179_s17 = smul.u32 22, %s1707_s10  ;;  %s1126_s3 = sshll.u32 %s1707_s10, 4 }
  0x13   : > { %s1178_s18 = smul.u32 11, %s165_s16  ;;  %s177_s4 = sadd.s32 %s1126_s3, %s1709_s30 }
  0x14   : > { %s1127_s5 = sshll.u32 %s177_s4, 3 }
  0x15   : > { %s168_s19 = sadd.s32 %s1179_s17, %s1178_s18  ;;  %s1668_s8 = scalar_lea.vmem %s1695_s2, %s1127_s5 }
  0x16   : > { %s1124_s20 = sshll.u32 %s168_s19, 2 }
  0x17   : > { %s1376_s23 = scalar_lea.vmem %s1693_s0, %s1124_s20 }
  0x18   : > { %v1379_v0 = vld [vmem:[%s1376_s23 + $0x8] sm:$0xff]  ;;  %v216_v1 = vld [vmem:[%s1376_s23] sm:$0xff]  ;;  %v1383_v2 = vld [vmem:[%s1376_s23 + $0x10] sm:$0xff] }
  0x19   : > { %237 = vrot.lane.b32.xlu1 %v1379_v0, %s1317_s24  ;;  %v1389_v3 = vcombine.low %v1379_v0, %v1379_v0  ;;  %233 = vrot.lane.b32.xlu0 %v216_v1, %s1317_s24  ;;  %v1394_v4 = vcombine.high %v1379_v0, %v1379_v0  ;;  %v356_v5 = vld [vmem:[%s1376_s23 + $0xc] sm:$0xff]  ;;  %v1398_v6 = vld [vmem:[%s1376_s23 + $0x4] sm:$0xff]  ;;  %208 = vst [vmem:[#allocation2] sm:$0xf] %v216_v1  ;;  %210 = vst [vmem:[#allocation2 + $0x10] sm:$0xf] %v1379_v0 }
  0x1a   : > { %484 = vst [vmem:[#allocation2 + $0xc0] sm:$0xf] %v1379_v0  ;;  %486 = vst [vmem:[#allocation2 + $0xd0] sm:$0xf] %v1383_v2  ;;  %v1406_v7 = vcombine.high %v1383_v2, %v1383_v2  ;;  %v284_v8 = vcombine.high %v216_v1, %v216_v1  ;;  %v1409_v9 = vld [vmem:[%s1376_s23 + $0x14] sm:$0xff]  ;;  %v422_v11 = vcombine.low %v356_v5, %v356_v5  ;;  %v1418_v13 = vld [vmem:[%s1376_s23 + $0x1c] sm:$0xff] }
  0x1b   : > { %212 = vst [vmem:[#allocation2 + $0x20] sm:$0xf] %v1383_v2  ;;  %v1412_v10 = vld [vmem:[%s1376_s23 + $0x18] sm:$0xff]  ;;  %348 = vst [vmem:[#allocation2 + $0x48] sm:$0xf0] %v1398_v6  ;;  %v421_v12 = vcombine.low %v1398_v6, %v1398_v6  ;;  %v423_v14 = vcombine.low %v1409_v9, %v1409_v9  ;;  %v1440_v16 = vcombine.low %v1418_v13, %v1418_v13  ;;  %v1443_v17 = vld [vmem:[%s1376_s23 + $0x20] sm:$0xff] }
  0x1c   : > { %350 = vst [vmem:[#allocation2 + $0x58] sm:$0xf0] %v356_v5  ;;  %211 = vst [vmem:[#allocation2 + $0x18] sm:$0xf] %v1394_v4  ;;  %v1429_v15 = vcombine.high %v1412_v10, %v1412_v10  ;;  %v1447_v18 = vcombine.high %v1443_v17, %v1443_v17  ;;  %v228_v19 = vcombine.low %v1383_v2, %v1383_v2  ;;  %v1237_v24 = vld [vmem:[%s1376_s23 + $0x20] ss:$0 sps:$4 sm:$0xff]  }
  0x1d   : > { %485 = vst [vmem:[#allocation2 + $0xc8] sm:$0xf] %v1394_v4  ;;  %352 = vst [vmem:[#allocation2 + $0x68] sm:$0xf0] %v1409_v9  ;;  %292 = vrot.lane.b32.xlu1 %v1379_v0, %s1318_s25  ;;  %235 = vrot.lane.b32.xlu0 %v1389_v3, %s1317_s24  ;;  %v226_v20 = vcombine.low %v216_v1, %v216_v1  ;;  %v365_v21 = vcombine.high %v1398_v6, %v1398_v6  ;;  %v278_v27 = vld [vmem:[%s1376_s23 + $0x20] sm:$0xf] }
  0x1e   : > { %214 = vst [vmem:[#allocation2 + $0x30] sm:$0xf] %v1412_v10  ;;  %488 = vst [vmem:[#allocation2 + $0xe0] sm:$0xf] %v1412_v10  ;;  %v366_v22 = vcombine.high %v356_v5, %v356_v5  ;;  %v504_v23 = vcombine.low %v1412_v10, %v1412_v10  ;;  %v367_v28 = vcombine.high %v1409_v9, %v1409_v9  ;;  %v359_v30 = vld [vmem:[%s1376_s23 + $0x24] sm:$0xf] }
  0x1f   : > { %209 = vst [vmem:[#allocation2 + $0x8] sm:$0xf] %v284_v8  ;;  %487 = vst [vmem:[#allocation2 + $0xd8] sm:$0xf] %v1406_v7  ;;  %v368_v29 = vcombine.high %v1418_v13, %v1418_v13  ;;  %v1241_v31 = vld [vmem:[%s1376_s23 + $0x24] ss:$0 sps:$4 sm:$0xff]   ;;  %v505_v32 = vcombine.low %v1443_v17, %v1443_v17 }
  0x20   : > { %213 = vst [vmem:[#allocation2 + $0x28] sm:$0xf] %v1406_v7  ;;  %354 = vst [vmem:[#allocation2 + $0x78] sm:$0xf0] %v1418_v13  ;;  %v1243_v33 = vld [vmem:[%s1376_s23 + $0x28] ss:$0 sps:$4 sm:$0xff]  }
  0x21   : > { %349 = vst [vmem:[#allocation2 + $0x50] sm:$0xf0] %v422_v11  ;;  %347 = vst [vmem:[#allocation2 + $0x40] sm:$0xf0] %v421_v12  ;;  %296 = vrot.lane.b32.xlu1 %v1383_v2, %s1318_s25  ;;  %290 = vrot.lane.b32.xlu0 %v284_v8, %s1318_s25  ;;  %v553_v34 = vld [vmem:[%s1376_s23 + $0x28] sm:$0xf] }
  0x22   : > { %351 = vst [vmem:[#allocation2 + $0x60] sm:$0xf0] %v423_v14  ;;  %215 = vst [vmem:[#allocation2 + $0x38] sm:$0xf] %v1429_v15 }
  0x23   : > { %489 = vst [vmem:[#allocation2 + $0xe8] sm:$0xf] %v1429_v15  ;;  %490 = vst [vmem:[#allocation2 + $0xf0] sm:$0xf] %v1443_v17 }
  0x24   : > { %353 = vst [vmem:[#allocation2 + $0x70] sm:$0xf0] %v1440_v16  ;;  %491 = vst [vmem:[#allocation2 + $0xf8] sm:$0xf] %v1447_v18 }
  0x25   : > { %239 = vrot.lane.b32.xlu1 %v228_v19, %s1317_s24  ;;  %294 = vrot.lane.b32.xlu0 %v1394_v4, %s1318_s25 }
  0x29   : > { %288 = vrot.lane.b32.xlu1 %v216_v1, %s1318_s25  ;;  %231 = vrot.lane.b32.xlu0 %v226_v20, %s1317_s24 }
  0x2d   : > { %373 = vrot.lane.b32.xlu1 %v356_v5, %s1317_s24  ;;  %371 = vrot.lane.b32.xlu0 %v365_v21, %s1317_s24 }
  0x31   : > { %377 = vrot.lane.b32.xlu1 %v1409_v9, %s1317_s24  ;;  %375 = vrot.lane.b32.xlu0 %v366_v22, %s1317_s24 }
  0x35   : > { %430 = vrot.lane.b32.xlu1 %v422_v11, %s1318_s25  ;;  %428 = vrot.lane.b32.xlu0 %v1398_v6, %s1318_s25 }
  0x39   : > { %434 = vrot.lane.b32.xlu1 %v423_v14, %s1318_s25  ;;  %432 = vrot.lane.b32.xlu0 %v356_v5, %s1318_s25 }
  0x3d   : > { %511 = vrot.lane.b32.xlu1 %v228_v19, %s1317_s24  ;;  %509 = vrot.lane.b32.xlu0 %v1379_v0, %s1317_s24 }
  0x41   : > { %515 = vrot.lane.b32.xlu1 %v504_v23, %s1317_s24  ;;  %513 = vrot.lane.b32.xlu0 %v1383_v2, %s1317_s24 }
  0x45   : > { %426 = vrot.lane.b32.xlu1 %v421_v12, %s1318_s25  ;;  %369 = vrot.lane.b32.xlu0 %v1398_v6, %s1317_s24 }
  0x49   : > { %241 = vrot.lane.b32.xlu1 %v1383_v2, %s1317_s24  ;;  %507 = vrot.lane.b32.xlu0 %v1389_v3, %s1317_s24 }
  0x4d   : > { %245 = vrot.lane.b32.xlu1 %v1412_v10, %s1317_s24  ;;  %243 = vrot.lane.b32.xlu0 %v504_v23, %s1317_s24 }
  0x51   : > { %298 = vrot.lane.b32.xlu1 %v1406_v7, %s1318_s25  ;;  %247 = vrot.lane.b32.xlu0 %v1237_v24, %s1317_s24 }
  0x55   : > { %302 = vrot.lane.b32.xlu1 %v1429_v15, %s1318_s25  ;;  %300 = vrot.lane.b32.xlu0 %v1412_v10, %s1318_s25 }
  0x59   : > { %565 = vrot.lane.b32.xlu1 %v1394_v4, %s1318_s25  ;;  %304 = vrot.lane.b32.xlu0 %v278_v27, %s1318_s25 }
  0x5d   : > { %569 = vrot.lane.b32.xlu1 %v1406_v7, %s1318_s25  ;;  %567 = vrot.lane.b32.xlu0 %v1383_v2, %s1318_s25 }
  0x61   : > { %563 = vrot.lane.b32.xlu1 %v1379_v0, %s1318_s25  ;;  %571 = vrot.lane.b32.xlu0 %v1412_v10, %s1318_s25 }
  0x65   : > { %381 = vrot.lane.b32.xlu1 %v1418_v13, %s1317_s24  ;;  %379 = vrot.lane.b32.xlu0 %v367_v28, %s1317_s24 }
  0x69   : > { %385 = vrot.lane.b32.xlu1 %v359_v30, %s1317_s24  ;;  %383 = vrot.lane.b32.xlu0 %v368_v29, %s1317_s24 }
  0x6d   : > { %438 = vrot.lane.b32.xlu1 %v1440_v16, %s1318_s25  ;;  %436 = vrot.lane.b32.xlu0 %v1409_v9, %s1318_s25 }
  0x71   : > { %442 = vrot.lane.b32.xlu1 %v1241_v31, %s1318_s25  ;;  %440 = vrot.lane.b32.xlu0 %v1418_v13, %s1318_s25 }
  0x75   : > { %519 = vrot.lane.b32.xlu1 %v505_v32, %s1317_s24  ;;  %517 = vrot.lane.b32.xlu0 %v1412_v10, %s1317_s24 }
  0x79   : > { %523 = vrot.lane.b32.xlu1 %v1243_v33, %s1317_s24  ;;  %521 = vrot.lane.b32.xlu0 %v1443_v17, %s1317_s24 }
  0x7d   : > { %575 = vrot.lane.b32.xlu1 %v1443_v17, %s1318_s25  ;;  %573 = vrot.lane.b32.xlu0 %v1429_v15, %s1318_s25 }
  0x81   : > { %579 = vrot.lane.b32.xlu1 %v553_v34, %s1318_s25  ;;  %577 = vrot.lane.b32.xlu0 %v1447_v18, %s1318_s25 }
  0x8b   : > { %v238_v35 = vpop.permute.xlu1 %237  ;;  %v234_v36 = vpop.permute.xlu0 %233 }
  0x8f   : > { %v293_v37 = vpop.permute.xlu1 %292  ;;  %v236_v38 = vpop.permute.xlu0 %235 }
  0x90   : > { %v251_v39 = vsel %vm249_vm0, %v234_v36, %v236_v38  ;;  %v252_v40 = vsel %vm249_vm0, %v236_v38, %v238_v35 }
  0x91   : > { %267 = vst [vmem:[#allocation2 + $0x8] sm:$0xf0] %v251_v39  ;;  %268 = vst [vmem:[#allocation2 + $0x10] sm:$0xf0] %v252_v40 }
  0x93   : > { %v1561_v41 = vpop.permute.xlu1 %296  ;;  %v291_v42 = vpop.permute.xlu0 %290 }
  0x94   : > { %v308_v43 = vsel %vm306_vm1, %v291_v42, %v293_v37 }
  0x95   : > { %324 = vst [vmem:[#allocation2 + $0x48] sm:$0xf] %v308_v43 }
  0x97   : > { %v1564_v44 = vpop.permute.xlu1 %239  ;;  %v295_v45 = vpop.permute.xlu0 %294 }
  0x98   : > { %v253_v46 = vsel %vm249_vm0, %v238_v35, %v1564_v44  ;;  %v309_v47 = vsel %vm306_vm1, %v293_v37, %v295_v45  ;;  %v310_v48 = vsel %vm306_vm1, %v295_v45, %v1561_v41  ;;  %v608_v53 = vld [vmem:[#allocation2 + $0x8] sm:$0xff]  ;;  %v609_v58 = vld [vmem:[#allocation2 + $0x10] sm:$0xff] }
  0x99   : > { %269 = vst [vmem:[#allocation2 + $0x18] sm:$0xf0] %v253_v46  ;;  %325 = vst [vmem:[#allocation2 + $0x50] sm:$0xf] %v309_v47 }
  0x9a   : > { %326 = vst [vmem:[#allocation2 + $0x58] sm:$0xf] %v310_v48 }
  0x9b   : > { %v289_v49 = vpop.permute.xlu1 %288  ;;  %v232_v50 = vpop.permute.xlu0 %231 }
  0x9c   : > { %v307_v51 = vsel %vm306_vm1, %v289_v49, %v291_v42  ;;  %v250_v52 = vsel %vm249_vm0, %v232_v50, %v234_v36  ;;  %v616_v54 = vld [vmem:[#allocation2 + $0x48] sm:$0xff] }
  0x9d   : > { %323 = vst [vmem:[#allocation2 + $0x40] sm:$0xf] %v307_v51  ;;  %266 = vst [vmem:[#allocation2] sm:$0xf0] %v250_v52  ;;  %v1146_v55 = vpack.c.bf16 %v616_v54, %v608_v53 }
  0x9f   : > { %v374_v56 = vpop.permute.xlu1 %373  ;;  %v372_v57 = vpop.permute.xlu0 %371  ;;  %1147 = vmatprep.subr.bf16.mxu0 %v1146_v55 }
  0xa0   : > { %v388_v59 = vsel %vm249_vm0, %v372_v57, %v374_v56  ;;  %v610_v60 = vld [vmem:[#allocation2 + $0x18] sm:$0xff]  ;;  %v617_v62 = vld [vmem:[#allocation2 + $0x50] sm:$0xff] }
  0xa1   : > { %v618_v61 = vld [vmem:[#allocation2 + $0x58] sm:$0xff]  ;;  %404 = vst [vmem:[#allocation2 + $0x88] sm:$0xf] %v388_v59  ;;  %v1156_v0 = vpack.c.bf16 %v617_v62, %v609_v58 }
  0xa2   : > { %v1154_v63 = vpack.c.bf16 %v618_v61, %v610_v60 }
  0xa3   : > { %v1574_v1 = vpop.permute.xlu1 %377  ;;  %v376_v2 = vpop.permute.xlu0 %375 }
  0xa4   : > { %1155 = vmatprep.subr.bf16.mxu1 %v1154_v63  ;;  %v389_v3 = vsel %vm249_vm0, %v374_v56, %v376_v2  ;;  %v390_v4 = vsel %vm249_vm0, %v376_v2, %v1574_v1  ;;  %v607_v5 = vld [vmem:[#allocation2] sm:$0xff] }
  0xa5   : > { %1157 = vmatpush1.bf16.msra.mxu1 %v1156_v0  ;;  %v615_v6 = vld [vmem:[#allocation2 + $0x40] sm:$0xff]  ;;  %405 = vst [vmem:[#allocation2 + $0x90] sm:$0xf] %v389_v3  ;;  %406 = vst [vmem:[#allocation2 + $0x98] sm:$0xf] %v390_v4 }
  0xa6   : > { %v1148_v7 = vpack.c.bf16 %v615_v6, %v607_v5 }
  0xa7   : > { %v431_v8 = vpop.permute.xlu1 %430  ;;  %v429_v9 = vpop.permute.xlu0 %428 }
  0xa8   : > { %1149 = vmatpush1.bf16.msra.mxu0 %v1148_v7  ;;  %v445_v10 = vsel %vm306_vm1, %v429_v9, %v431_v8 }
  0xa9   : > { %461 = vst [vmem:[#allocation2 + $0x88] sm:$0xf0] %v445_v10 }
  0xab   : > { %v1580_v11 = vpop.permute.xlu1 %434  ;;  %v433_v12 = vpop.permute.xlu0 %432 }
  0xac   : > { %v446_v13 = vsel %vm306_vm1, %v431_v8, %v433_v12  ;;  %v447_v14 = vsel %vm306_vm1, %v433_v12, %v1580_v11  ;;  %v1617_v8 = vld [vmem:[%s1694_s1] sm:$0xff] }
  0xad   : > { %462 = vst [vmem:[#allocation2 + $0x90] sm:$0xf0] %v446_v13  ;;  %463 = vst [vmem:[#allocation2 + $0x98] sm:$0xf0] %v447_v14 }
  0xaf   : > { %v512_v15 = vpop.permute.xlu1 %511  ;;  %v510_v16 = vpop.permute.xlu0 %509 }
  0xb0   : > { %v526_v17 = vsel %vm249_vm0, %v510_v16, %v512_v15  ;;  %v624_v27 = vld [vmem:[#allocation2 + $0x88] sm:$0xff] }
  0xb1   : > { %542 = vst [vmem:[#allocation2 + $0xc8] sm:$0xf0] %v526_v17 }
  0xb3   : > { %v1586_v18 = vpop.permute.xlu1 %515  ;;  %v514_v19 = vpop.permute.xlu0 %513 }
  0xb4   : > { %v527_v20 = vsel %vm249_vm0, %v512_v15, %v514_v19  ;;  %v528_v21 = vsel %vm249_vm0, %v514_v19, %v1586_v18  ;;  %v626_v32 = vld [vmem:[#allocation2 + $0x98] sm:$0xff]  ;;  %v625_v36 = vld [vmem:[#allocation2 + $0x90] sm:$0xff] }
  0xb5   : > { %543 = vst [vmem:[#allocation2 + $0xd0] sm:$0xf0] %v527_v20  ;;  %544 = vst [vmem:[#allocation2 + $0xd8] sm:$0xf0] %v528_v21 }
  0xb7   : > { %v427_v22 = vpop.permute.xlu1 %426  ;;  %v370_v23 = vpop.permute.xlu0 %369 }
  0xb8   : > { %v444_v24 = vsel %vm306_vm1, %v427_v22, %v429_v9  ;;  %v387_v25 = vsel %vm249_vm0, %v370_v23, %v372_v57  ;;  %v632_v28 = vld [vmem:[#allocation2 + $0xc8] sm:$0xff] }
  0xb9   : > { %460 = vst [vmem:[#allocation2 + $0x80] sm:$0xf0] %v444_v24  ;;  %403 = vst [vmem:[#allocation2 + $0x80] sm:$0xf] %v387_v25  ;;  %v1150_v29 = vpack.c.bf16 %v632_v28, %v624_v27 }
  0xbb   : > { %v242_v30 = vpop.permute.xlu1 %241  ;;  %v508_v31 = vpop.permute.xlu0 %507  ;;  %1151 = vmatprep.subr.bf16.mxu0 %v1150_v29 }
  0xbc   : > { %v254_v33 = vsel %vm249_vm0, %v1564_v44, %v242_v30  ;;  %v525_v34 = vsel %vm249_vm0, %v508_v31, %v510_v16  ;;  %v634_v35 = vld [vmem:[#allocation2 + $0xd8] sm:$0xff]  ;;  %v633_v37 = vld [vmem:[#allocation2 + $0xd0] sm:$0xff] }
  0xbd   : > { %270 = vst [vmem:[#allocation2 + $0x20] sm:$0xf0] %v254_v33  ;;  %541 = vst [vmem:[#allocation2 + $0xc0] sm:$0xf0] %v525_v34  ;;  %v1158_v38 = vpack.c.bf16 %v634_v35, %v626_v32  ;;  %v1160_v39 = vpack.c.bf16 %v633_v37, %v625_v36  ;;  %v1628_v32 = vld [vmem:[%s1694_s1 + $0x8] sm:$0xff] }
  0xbf   : > { %v246_v40 = vpop.permute.xlu1 %245  ;;  %v244_v42 = vpop.permute.xlu0 %243  ;;  %1159 = vmatprep.subr.bf16.mxu1 %v1158_v38 }
  0xc0   : > { %v255_v43 = vsel %vm249_vm0, %v242_v30, %v244_v42  ;;  %v256_v45 = vsel %vm249_vm0, %v244_v42, %v246_v40  ;;  %1161 = vmatpush1.bf16.msra.mxu1 %v1160_v39  ;;  %v623_v49 = vld [vmem:[#allocation2 + $0x80] sm:$0xff] }
  0xc1   : > { %271 = vst [vmem:[#allocation2 + $0x28] sm:$0xf0] %v255_v43  ;;  %272 = vst [vmem:[#allocation2 + $0x30] sm:$0xf0] %v256_v45 }
  0xc3   : > { %v299_v44 = vpop.permute.xlu1 %298  ;;  %v248_v46 = vpop.permute.xlu0 %247 }
  0xc4   : > { %v311_v47 = vsel %vm306_vm1, %v1561_v41, %v299_v44  ;;  %v257_v48 = vsel %vm249_vm0, %v246_v40, %v248_v46  ;;  %v631_v50 = vld [vmem:[#allocation2 + $0xc0] sm:$0xff] }
  0xc5   : > { %327 = vst [vmem:[#allocation2 + $0x60] sm:$0xf] %v311_v47  ;;  %273 = vst [vmem:[#allocation2 + $0x38] sm:$0xf0] %v257_v48  ;;  %v1152_v51 = vpack.c.bf16 %v631_v50, %v623_v49  ;;  %v611_v23 = vld [vmem:[#allocation2 + $0x20] sm:$0xff] }
  0xc7   : > { %v303_v52 = vpop.permute.xlu1 %302  ;;  %v301_v53 = vpop.permute.xlu0 %300  ;;  %1153 = vmatpush1.bf16.msra.mxu0 %v1152_v51 }
  0xc8   : > { %v312_v54 = vsel %vm306_vm1, %v299_v44, %v301_v53  ;;  %v313_v55 = vsel %vm306_vm1, %v301_v53, %v303_v52  ;;  %v612_v13 = vld [vmem:[#allocation2 + $0x28] sm:$0xff]  ;;  %v613_v28 = vld [vmem:[#allocation2 + $0x30] sm:$0xff] }
  0xc9   : > { %328 = vst [vmem:[#allocation2 + $0x68] sm:$0xf] %v312_v54  ;;  %329 = vst [vmem:[#allocation2 + $0x70] sm:$0xf] %v313_v55 }
  0xcb   : > { %v566_v56 = vpop.permute.xlu1 %565  ;;  %v305_v57 = vpop.permute.xlu0 %304 }
  0xcc   : > { %v314_v41 = vsel %vm306_vm1, %v303_v52, %v305_v57  ;;  %v619_v14 = vld [vmem:[#allocation2 + $0x60] sm:$0xff]  ;;  %v614_v24 = vld [vmem:[#allocation2 + $0x38] sm:$0xff] }
  0xcd   : > { %330 = vst [vmem:[#allocation2 + $0x78] sm:$0xf] %v314_v41  ;;  %v1164_v25 = vpack.c.bf16 %v619_v14, %v611_v23 }
  0xcf   : > { %v570_v58 = vpop.permute.xlu1 %569  ;;  %v568_v59 = vpop.permute.xlu0 %567 }
  0xd0   : > { %v582_v60 = vsel %vm306_vm1, %v566_v56, %v568_v59  ;;  %v583_v61 = vsel %vm306_vm1, %v568_v59, %v570_v58  ;;  %v620_v9 = vld [vmem:[#allocation2 + $0x68] sm:$0xff]  ;;  %v621_v20 = vld [vmem:[#allocation2 + $0x70] sm:$0xff] }
  0xd1   : > { %598 = vst [vmem:[#allocation2 + $0x108] sm:$0xf] %v582_v60  ;;  %599 = vst [vmem:[#allocation2 + $0x110] sm:$0xf] %v583_v61  ;;  %v1162_v22 = vpack.c.bf16 %v620_v9, %v612_v13  ;;  %v1172_v31 = vpack.c.bf16 %v621_v20, %v613_v28 }
  0xd3   : > { %v564_v62 = vpop.permute.xlu1 %563  ;;  %v1606_v63 = vpop.permute.xlu0 %571 }
  0xd4   : > { %v581_v0 = vsel %vm306_vm1, %v564_v62, %v566_v56  ;;  %v584_v2 = vsel %vm306_vm1, %v570_v58, %v1606_v63  ;;  %v622_v15 = vld [vmem:[#allocation2 + $0x78] sm:$0xff] }
  0xd5   : > { %597 = vst [vmem:[#allocation2 + $0x100] sm:$0xf] %v581_v0  ;;  %600 = vst [vmem:[#allocation2 + $0x118] sm:$0xf] %v584_v2  ;;  %v1170_v27 = vpack.c.bf16 %v622_v15, %v614_v24 }
  0xd7   : > { %v382_v3 = vpop.permute.xlu1 %381  ;;  %v380_v4 = vpop.permute.xlu0 %379 }
  0xd8   : > { %v391_v5 = vsel %vm249_vm0, %v1574_v1, %v380_v4  ;;  %v392_v6 = vsel %vm249_vm0, %v380_v4, %v382_v3  ;;  %v640_v7 = vld [vmem:[#allocation2 + $0x108] sm:$0xff]  ;;  %v641_v21 = vld [vmem:[#allocation2 + $0x110] sm:$0xff] }
  0xd9   : > { %407 = vst [vmem:[#allocation2 + $0xa0] sm:$0xf] %v391_v5  ;;  %408 = vst [vmem:[#allocation2 + $0xa8] sm:$0xf] %v392_v6  ;;  %662 = vmatprep.subr.mxu0 %v640_v7 }
  0xdb   : > { %v386_v10 = vpop.permute.xlu1 %385  ;;  %v384_v12 = vpop.permute.xlu0 %383 }
  0xdc   : > { %v393_v1 = vsel %vm249_vm0, %v382_v3, %v384_v12  ;;  %v394_v16 = vsel %vm249_vm0, %v384_v12, %v386_v10  ;;  %v639_v17 = vld [vmem:[#allocation2 + $0x100] sm:$0xff]  ;;  %v642_v19 = vld [vmem:[#allocation2 + $0x118] sm:$0xff] }
  0xdd   : > { %409 = vst [vmem:[#allocation2 + $0xb0] sm:$0xf] %v393_v1  ;;  %410 = vst [vmem:[#allocation2 + $0xb8] sm:$0xf] %v394_v16  ;;  %663 = vmatpush1.msra.mxu0 %v639_v17  ;;  %739 = vmatprep.subr.mxu1 %v642_v19 }
  0xde   : > { %1128 = vmatmul.mubr.msk.f32.vlgmr.msra.gmra.mrb[0].mxu0 %vm647_vm2, %v1617_v8  ;;  %740 = vmatpush1.msra.mxu1 %v641_v21 }
  0xdf   : > { %1163 = vmatprep.subr.bf16.mxu0 %v1162_v22  ;;  %v439_v29 = vpop.permute.xlu1 %438  ;;  %v437_v30 = vpop.permute.xlu0 %436  ;;  %1130 = vmatmul.mubr.msk.f32.vlgmr.msra.gmra.mrb[0].mxu1 %vm647_vm2, %v1617_v8 }
  0xe0   : > { %v448_v33 = vsel %vm306_vm1, %v1580_v11, %v437_v30  ;;  %v449_v34 = vsel %vm306_vm1, %v437_v30, %v439_v29  ;;  %1165 = vmatpush1.bf16.msra.mxu0 %v1164_v25  ;;  %1171 = vmatprep.subr.bf16.mxu1 %v1170_v27 }
  0xe1   : > { %464 = vst [vmem:[#allocation2 + $0xa0] sm:$0xf0] %v448_v33  ;;  %465 = vst [vmem:[#allocation2 + $0xa8] sm:$0xf0] %v449_v34  ;;  %1173 = vmatpush1.bf16.msra.mxu1 %v1172_v31  ;;  %724 = vmatprep.mubr.f32.mxu0 %v1320_v26 }
  0xe2   : > { %1129 = vmatmul.mubr.msk.f32.gmra.mrb[2].mxu0 %vm647_vm2, %v1628_v32  ;;  %801 = vmatprep.mubr.f32.mxu1 %v1320_v26 }
  0xe3   : > { %v443_v35 = vpop.permute.xlu1 %442  ;;  %v441_v36 = vpop.permute.xlu0 %440  ;;  %1131 = vmatmul.mubr.msk.f32.gmra.mrb[2].mxu1 %vm647_vm2, %v1628_v32  ;;  %872 = vmatprep.mubr.f32.mxu0 %v1320_v26 }
  0xe4   : > { %v450_v11 = vsel %vm306_vm1, %v439_v29, %v441_v36  ;;  %v451_v37 = vsel %vm306_vm1, %v441_v36, %v443_v35  ;;  %949 = vmatprep.mubr.f32.mxu1 %v1320_v26 }
  0xe5   : > { %466 = vst [vmem:[#allocation2 + $0xb0] sm:$0xf0] %v450_v11  ;;  %467 = vst [vmem:[#allocation2 + $0xb8] sm:$0xf0] %v451_v37 }
  0xe7   : > { %v520_v38 = vpop.permute.xlu1 %519  ;;  %v518_v39 = vpop.permute.xlu0 %517 }
  0xe8   : > { %v529_v40 = vsel %vm249_vm0, %v1586_v18, %v518_v39  ;;  %v530_v42 = vsel %vm249_vm0, %v518_v39, %v520_v38  ;;  %v628_v49 = vld [vmem:[#allocation2 + $0xa8] sm:$0xff]  ;;  %v627_v52 = vld [vmem:[#allocation2 + $0xa0] sm:$0xff] }
  0xe9   : > { %545 = vst [vmem:[#allocation2 + $0xe0] sm:$0xf0] %v529_v40  ;;  %546 = vst [vmem:[#allocation2 + $0xe8] sm:$0xf0] %v530_v42 }
  0xeb   : > { %v524_v43 = vpop.permute.xlu1 %523  ;;  %v522_v45 = vpop.permute.xlu0 %521 }
  0xec   : > { %v531_v44 = vsel %vm249_vm0, %v520_v38, %v522_v45  ;;  %v532_v46 = vsel %vm249_vm0, %v522_v45, %v524_v43  ;;  %v630_v41 = vld [vmem:[#allocation2 + $0xb8] sm:$0xff]  ;;  %v629_v61 = vld [vmem:[#allocation2 + $0xb0] sm:$0xff] }
  0xed   : > { %547 = vst [vmem:[#allocation2 + $0xf0] sm:$0xf0] %v531_v44  ;;  %548 = vst [vmem:[#allocation2 + $0xf8] sm:$0xf0] %v532_v46 }
  0xef   : > { %v576_v47 = vpop.permute.xlu1 %575  ;;  %v574_v48 = vpop.permute.xlu0 %573 }
  0xf0   : > { %v585_v50 = vsel %vm306_vm1, %v1606_v63, %v574_v48  ;;  %v586_v18 = vsel %vm306_vm1, %v574_v48, %v576_v47  ;;  %v636_v51 = vld [vmem:[#allocation2 + $0xe8] sm:$0xff]  ;;  %v635_v53 = vld [vmem:[#allocation2 + $0xe0] sm:$0xff] }
  0xf1   : > { %601 = vst [vmem:[#allocation2 + $0x120] sm:$0xf] %v585_v50  ;;  %602 = vst [vmem:[#allocation2 + $0x128] sm:$0xf] %v586_v18  ;;  %v1166_v54 = vpack.c.bf16 %v636_v51, %v628_v49  ;;  %v1168_v55 = vpack.c.bf16 %v635_v53, %v627_v52 }
  0xf3   : > { %v580_v56 = vpop.permute.xlu1 %579  ;;  %v578_v57 = vpop.permute.xlu0 %577  ;;  %1167 = vmatprep.subr.bf16.mxu0 %v1166_v54 }
  0xf4   : > { %v587_v58 = vsel %vm306_vm1, %v576_v47, %v578_v57  ;;  %v588_v59 = vsel %vm306_vm1, %v578_v57, %v580_v56  ;;  %1169 = vmatpush1.bf16.msra.mxu0 %v1168_v55  ;;  %v638_v60 = vld [vmem:[#allocation2 + $0xf8] sm:$0xff]  ;;  %v637_v62 = vld [vmem:[#allocation2 + $0xf0] sm:$0xff] }
  0xf5   : > { %603 = vst [vmem:[#allocation2 + $0x130] sm:$0xf] %v587_v58  ;;  %604 = vst [vmem:[#allocation2 + $0x138] sm:$0xf] %v588_v59  ;;  %v1174_v63 = vpack.c.bf16 %v638_v60, %v630_v41  ;;  %v1176_v0 = vpack.c.bf16 %v637_v62, %v629_v61 }
  0xf7   : > { %1175 = vmatprep.subr.bf16.mxu1 %v1174_v63 }
  0xf8   : > { %1177 = vmatpush1.bf16.msra.mxu1 %v1176_v0  ;;  %v644_v2 = vld [vmem:[#allocation2 + $0x128] sm:$0xff]  ;;  %v643_v3 = vld [vmem:[#allocation2 + $0x120] sm:$0xff] }
  0xf9   : > { %816 = vmatprep.subr.mxu0 %v644_v2 }
  0xfa   : > { %817 = vmatpush1.msra.mxu0 %v643_v3 }
  0xfb   : > { %1132 = vmatmul.mubr.msk.f32.vlgmr.msra.gmra.mrb[4].mxu0 %vm647_vm2, %v1617_v8 }
  0xfc   : > { %v646_v4 = vld [vmem:[#allocation2 + $0x138] sm:$0xff]  ;;  %878 = vmatprep.mubr.f32.mxu0 %v1320_v26  ;;  %v645_v5 = vld [vmem:[#allocation2 + $0x130] sm:$0xff] }
  0xfd   : > { %893 = vmatprep.subr.mxu1 %v646_v4 }
  0xfe   : > { %894 = vmatpush1.msra.mxu1 %v645_v5 }
  0xff   : > { %1133 = vmatmul.mubr.msk.f32.gmra.mrb[6].mxu0 %vm647_vm2, %v1628_v32  ;;  %1134 = vmatmul.mubr.msk.f32.vlgmr.msra.gmra.mrb[4].mxu1 %vm647_vm2, %v1617_v8 }
 0x100   : > { %955 = vmatprep.mubr.f32.mxu1 %v1320_v26 }
 0x103   : > { %1135 = vmatmul.mubr.msk.f32.gmra.mrb[6].mxu1 %vm647_vm2, %v1628_v32 }
 0x1b1   : > { %v720_v6 = vpop.f32.mrb[0].mxu0 }
 0x1b2   : > { %v722_v7 = vpop.f32.mrb[1].mxu0  ;;  %v797_v9 = vpop.f32.mrb[0].mxu1 }
 0x1b3   : > { %v799_v10 = vpop.f32.mrb[1].mxu1 }
 0x1b5   : > { %v726_v12 = vpop.f32.mrb[2].mxu0 }
 0x1b6   : > { %v1136_v13 = vmul.f32 -1.442695, %v726_v12  ;;  %v728_v14 = vpop.f32.mrb[3].mxu0  ;;  %v803_v15 = vpop.f32.mrb[2].mxu1 }
 0x1b7   : > { %v1137_v1 = vmul.f32 -1.442695, %v728_v14  ;;  %v1138_v16 = vmul.f32 -1.442695, %v803_v15  ;;  %v805_v17 = vpop.f32.mrb[3].mxu1 }
 0x1b8   : > { %1245 = vpow2.f32 %v1136_v13  ;;  %v1139_v8 = vmul.f32 -1.442695, %v805_v17 }
 0x1b9   : > { %1247 = vpow2.f32 %v1137_v1 }
 0x1ba   : > { %1249 = vpow2.f32 %v1138_v16 }
 0x1bb   : > { %1251 = vpow2.f32 %v1139_v8 }
 0x1c2   : > { %v1246_v26 = vpop.eup %1245 }
 0x1c3   : > { %v1248_v19 = vpop.eup %1247  ;;  %v986_v20 = vadd.f32 1.0, %v1246_v26 }
 0x1c4   : > { %v1250_v21 = vpop.eup %1249  ;;  %v987_v22 = vadd.f32 1.0, %v1248_v19 }
 0x1c5   : > { %v1252_v23 = vpop.eup %1251  ;;  %1253 = vrcp.f32 %v986_v20  ;;  %v988_v24 = vadd.f32 1.0, %v1250_v21 }
 0x1c6   : > { %1255 = vrcp.f32 %v987_v22  ;;  %v989_v25 = vadd.f32 1.0, %v1252_v23 }
 0x1c7   : > { %1257 = vrcp.f32 %v988_v24 }
 0x1c8   : > { %1259 = vrcp.f32 %v989_v25 }
 0x1ce   : > { %v874_v27 = vpop.f32.mrb[4].mxu0 }
 0x1cf   : > { %v1254_v28 = vpop.eup %1253  ;;  %v876_v29 = vpop.f32.mrb[5].mxu0 }
 0x1d0   : > { %v1256_v30 = vpop.eup %1255  ;;  %v1010_v31 = vmul.f32 %v1254_v28, %v720_v6 }
 0x1d1   : > { %v1258_v32 = vpop.eup %1257  ;;  %v1011_v33 = vmul.f32 %v1256_v30, %v722_v7 }
 0x1d2   : > { %v1260_v34 = vpop.eup %1259  ;;  %1018 = vst [vmem:[%s1668_s8] sm:$0xff] %v1010_v31  ;;  %v1012_v35 = vmul.f32 %v1258_v32, %v797_v9  ;;  %v880_v36 = vpop.f32.mrb[6].mxu0 }
 0x1d3   : > { %v951_v11 = vpop.f32.mrb[4].mxu1  ;;  %1019 = vst [vmem:[%s1668_s8 + $0x8] sm:$0xff] %v1011_v33  ;;  %v1013_v37 = vmul.f32 %v1260_v34, %v799_v10  ;;  %v1140_v38 = vmul.f32 -1.442695, %v880_v36  ;;  %v882_v39 = vpop.f32.mrb[7].mxu0 }
 0x1d4   : > { %v953_v40 = vpop.f32.mrb[5].mxu1  ;;  %1020 = vst [vmem:[%s1668_s8 + $0x10] sm:$0xff] %v1012_v35  ;;  %v1141_v42 = vmul.f32 -1.442695, %v882_v39 }
 0x1d5   : > { %1021 = vst [vmem:[%s1668_s8 + $0x18] sm:$0xff] %v1013_v37  ;;  %1261 = vpow2.f32 %v1140_v38 }
 0x1d6   : > { %1263 = vpow2.f32 %v1141_v42  ;;  %v957_v43 = vpop.f32.mrb[6].mxu1 }
 0x1d7   : > { %v1142_v45 = vmul.f32 -1.442695, %v957_v43  ;;  %v959_v44 = vpop.f32.mrb[7].mxu1 }
 0x1d8   : > { %v1143_v46 = vmul.f32 -1.442695, %v959_v44 }
 0x1d9   : > { %1265 = vpow2.f32 %v1142_v45 }
 0x1da   : > { %1267 = vpow2.f32 %v1143_v46 }
 0x1df   : > { %v1262_v47 = vpop.eup %1261 }
 0x1e0   : > { %v1264_v48 = vpop.eup %1263  ;;  %v990_v49 = vadd.f32 1.0, %v1262_v47 }
 0x1e1   : > { %v991_v50 = vadd.f32 1.0, %v1264_v48 }
 0x1e2   : > { %1269 = vrcp.f32 %v990_v49 }
 0x1e3   : > { %v1266_v18 = vpop.eup %1265  ;;  %1271 = vrcp.f32 %v991_v50 }
 0x1e4   : > { %v1268_v51 = vpop.eup %1267  ;;  %v992_v52 = vadd.f32 1.0, %v1266_v18 }
 0x1e5   : > { %v993_v53 = vadd.f32 1.0, %v1268_v51 }
 0x1e6   : > { %1273 = vrcp.f32 %v992_v52 }
 0x1e7   : > { %1275 = vrcp.f32 %v993_v53 }
 0x1ec   : > { %v1270_v54 = vpop.eup %1269 }
 0x1ed   : > { %v1272_v55 = vpop.eup %1271  ;;  %v1014_v56 = vmul.f32 %v1270_v54, %v874_v27 }
 0x1ee   : > { %v1015_v57 = vmul.f32 %v1272_v55, %v876_v29 }
 0x1ef   : > { %1022 = vst [vmem:[%s1668_s8 + $0x20] sm:$0xff] %v1014_v56 }
 0x1f0   : > { %v1274_v41 = vpop.eup %1273  ;;  %1023 = vst [vmem:[%s1668_s8 + $0x28] sm:$0xff] %v1015_v57 }
 0x1f1   : > { %v1276_v58 = vpop.eup %1275  ;;  %v1016_v59 = vmul.f32 %v1274_v41, %v951_v11 }
 0x1f2   : > { %v1017_v60 = vmul.f32 %v1276_v58, %v953_v40 }
 0x1f3   : > { %1024 = vst [vmem:[%s1668_s8 + $0x30] sm:$0xff] %v1016_v59 }
 0x1f4   : > { %1025 = vst [vmem:[%s1668_s8 + $0x38] sm:$0xff] %v1017_v60 }
 0x1f5 PF: > { %s12_s13 = sadd.s32 1, %s1315_s13   ;;  %s1696_s9 = smov %s1307_s11 }
 0x1f6   : > { %p9_p8 = scmp.ge.s32.totalorder %s12_s13, 6   ;;  %s1697_s10 = smov %s1311_s12 }
 0x1f7   : > { %s1698_s11 = smov %s1701_s14  ;;  %s1699_s12 = smov %s1705_s15 }
 0x1f8   :  { %11 = sbr.rel (!%p9_p8) target bundleno = 3 (0x3), region = 59 }

</bundles_post_ra>
